<compile_context>
chip_gen: v5e
topology: v5e:2x2
jax: 0.10.0
libtpu: 0.0.40
codegen_flags: <defaults>
</compile_context>

<pallas_src>
import math

import jax
import jax.numpy as jnp
from jax.experimental import pallas as pl
from jax.experimental.pallas import tpu as pltpu


def _linear_kernel(x_ref, w_ref, b_ref, o_ref):
    # x_ref: (TG, K), w_ref: (K, N), b_ref: (1, N), o_ref: (TG, N)
    acc = jnp.dot(x_ref[...], w_ref[...], preferred_element_type=jnp.float32)
    o_ref[...] = (acc + b_ref[...].astype(jnp.float32)).astype(o_ref.dtype)


def _round_up(x, m):
    return (x + m - 1) // m * m


def _pick_pack(d_inp, d_model):
    """Pick P = rows packed per kernel row.

    Chosen so packed output width P*d_model is a multiple of 128 (unmasked, lane-dense
    stores) and packed input width P*d_inp stays within one 128-wide MXU contraction
    pass (so MXU work does not grow). Falls back to P=1 when packing does not pay off.
    """
    if d_model >= 128:
        return 1
    p0 = 128 // math.gcd(d_model, 128)  # smallest P making P*d_model % 128 == 0
    if p0 * d_inp > 128:
        return 1
    p = p0
    while (p + p0) * d_inp <= 128 and (p + p0) * d_model <= 1024:
        p += p0
    return p


def time_feature_embedding(x, weight, bias, *, block_rows=1024, vmem_budget=8 << 20):
    """x: (B, S, d_inp); weight: (d_model, d_inp) [PyTorch layout]; bias: (d_model,)."""
    B, S, d_inp = x.shape
    d_model = weight.shape[0]
    R = B * S

    P = _pick_pack(d_inp, d_model)
    K = P * d_inp
    N = P * d_model

    w_t = weight.T.astype(x.dtype)                           # (d_inp, d_model)
    if P > 1:
        # Block-diagonal weight: packed input cols [k*d_inp,(k+1)*d_inp) map to packed
        # output cols [k*d_model,(k+1)*d_model).  Exactly equivalent to per-row Linear.
        w_pk = jnp.kron(jnp.eye(P, dtype=x.dtype), w_t)      # (K, N)
        b_pk = jnp.tile(bias.astype(x.dtype), P).reshape(1, N)
    else:
        w_pk = w_t
        b_pk = bias.astype(x.dtype).reshape(1, N)

    itemsize = jnp.dtype(x.dtype).itemsize

    # Packed row-group count; tile rows chosen so double-buffered in+out tiles fit budget.
    G = pl.cdiv(R, P)
    rows_fit = max(8, vmem_budget // (2 * (K + N) * itemsize))
    TG = min(block_rows, rows_fit, _round_up(max(G, 1), 8))
    TG = max(8, (TG // 8) * 8)                               # multiple of 8 sublanes
    G_pad = _round_up(G, TG)
    R_pad = G_pad * P

    x2d = x.reshape(R, d_inp)
    if R_pad != R:
        x2d = jnp.pad(x2d, ((0, R_pad - R), (0, 0)))
    x_pk = x2d.reshape(G_pad, K)                             # contiguous -> free reshape

    flops = 2 * R * d_inp * d_model
    bytes_accessed = int(
        itemsize * (R * d_inp + d_inp * d_model + d_model + R * d_model)
    )

    out = pl.pallas_call(
        _linear_kernel,
        out_shape=jax.ShapeDtypeStruct((G_pad, N), x.dtype),
        grid_spec=pltpu.PrefetchScalarGridSpec(
            num_scalar_prefetch=0,
            grid=(G_pad // TG,),
            in_specs=[
                pl.BlockSpec((TG, K), lambda i: (i, 0)),     # row tile, pipelined
                pl.BlockSpec((K, N), lambda i: (0, 0)),      # weight resident in VMEM
                pl.BlockSpec((1, N), lambda i: (0, 0)),      # bias resident in VMEM
            ],
            out_specs=pl.BlockSpec((TG, N), lambda i: (i, 0)),
        ),
        compiler_params=pltpu.CompilerParams(
            dimension_semantics=("parallel",),
        ),
        cost_estimate=pl.CostEstimate(
            flops=flops, bytes_accessed=bytes_accessed, transcendentals=0
        ),
    )(x_pk, w_pk, b_pk)

    out2d = out.reshape(R_pad, d_model)                      # free reshape
    if R_pad != R:
        out2d = out2d[:R]                                    # drop padded rows
    return out2d.reshape(B, S, d_model)


if __name__ == "__main__":
    # freq='H' -> d_inp = 5 (per freq_map); small d_model = 32.
    freq_map = {"Y": 1, "M": 2, "D": 4, "H": 5, "T": 6, "S": 7}
    d_inp = freq_map["H"]
    d_model = 32
    batch, seq_len = 2, 8

    key = jax.random.PRNGKey(0)
    kx, kw, kb = jax.random.split(key, 3)

    # nn.Linear param shapes: W (d_model, d_inp), b (d_model,)
    bound = 1.0 / jnp.sqrt(jnp.float32(d_inp))
    weight = jax.random.uniform(kw, (d_model, d_inp), jnp.float32, -bound, bound)
    bias = jax.random.uniform(kb, (d_model,), jnp.float32, -bound, bound)

    x = jax.random.normal(kx, (batch, seq_len, d_inp), jnp.float32)

    out = time_feature_embedding(x, weight, bias)
    out = jax.block_until_ready(out)

    # Reference check in plain JAX
    ref = x @ weight.T + bias
    assert out.shape == (batch, seq_len, d_model)
    assert jnp.allclose(out, ref, atol=1e-5, rtol=1e-5)

    print("KERNEL_OK")
</pallas_src>

<mosaic_0001>
module attributes {stable_mosaic.version = 11 : i64} {
  func.func @_linear_kernel(%arg0: i32, %arg1: memref<8x120xf32, #tpu.memory_space<vmem>>, %arg2: memref<120x768xf32, #tpu.memory_space<vmem>>, %arg3: memref<1x768xf32, #tpu.memory_space<vmem>>, %arg4: memref<8x768xf32, #tpu.memory_space<vmem>>) attributes {dimension_semantics = [#tpu.dimension_semantics<parallel>], iteration_bounds = array<i64: 1>, scalar_prefetch = 0 : i64, scratch_operands = 0 : i64, tpu.core_type = #tpu.core_type<tc>, window_params = [{transform_indices = @transform_0, window_bounds = array<i64: 8, 120>}, {pipeline_mode = #tpu.pipeline_mode<synchronous>, transform_indices = @transform_1, window_bounds = array<i64: 120, 768>}, {pipeline_mode = #tpu.pipeline_mode<synchronous>, transform_indices = @transform_2, window_bounds = array<i64: 1, 768>}, {transform_indices = @transform_3, window_bounds = array<i64: 8, 768>}]} {
    %c0 = arith.constant 0 : index
    %c0_0 = arith.constant 0 : index
    %0 = vector.load %arg1[%c0, %c0_0] : memref<8x120xf32, #tpu.memory_space<vmem>>, vector<8x120xf32>
    %c0_1 = arith.constant 0 : index
    %c0_2 = arith.constant 0 : index
    %1 = vector.load %arg2[%c0_1, %c0_2] : memref<120x768xf32, #tpu.memory_space<vmem>>, vector<120x768xf32>
    %cst = arith.constant dense<0.000000e+00> : vector<8x768xf32>
    %2 = tpu.matmul %0, %1, %cst {dimension_numbers = #tpu.dot_dimension_numbers<[1], [0], [0], [1], [0, 0, 1, 1], [], []>} : vector<8x120xf32>, vector<120x768xf32>, vector<8x768xf32> -> vector<8x768xf32>
    %c0_3 = arith.constant 0 : index
    %c0_4 = arith.constant 0 : index
    %3 = vector.load %arg3[%c0_3, %c0_4] : memref<1x768xf32, #tpu.memory_space<vmem>>, vector<1x768xf32>
    %4 = vector.broadcast %3 : vector<1x768xf32> to vector<8x768xf32>
    %5 = arith.addf %2, %4 : vector<8x768xf32>
    %c0_5 = arith.constant 0 : index
    %c0_6 = arith.constant 0 : index
    %6 = vector.load %arg4[%c0_5, %c0_6] : memref<8x768xf32, #tpu.memory_space<vmem>>, vector<8x768xf32>
    tpu.vector_store %arg4[%c0_5, %c0_6], %5 {strides = array<i32>} : memref<8x768xf32, #tpu.memory_space<vmem>>, vector<8x768xf32>,
    return
  }
  func.func @transform_0(%arg0: i32) -> (i32, i32) {
    %c0_i32 = arith.constant 0 : i32
    %c0_i32_0 = arith.constant 0 : i32
    return %arg0, %c0_i32 : i32, i32
  }
  func.func @transform_1(%arg0: i32) -> (i32, i32) {
    %c0_i32 = arith.constant 0 : i32
    %c0_i32_0 = arith.constant 0 : i32
    %c0_i32_1 = arith.constant 0 : i32
    return %c0_i32, %c0_i32_0 : i32, i32
  }
  func.func @transform_2(%arg0: i32) -> (i32, i32) {
    %c0_i32 = arith.constant 0 : i32
    %c0_i32_0 = arith.constant 0 : i32
    %c0_i32_1 = arith.constant 0 : i32
    return %c0_i32, %c0_i32_0 : i32, i32
  }
  func.func @transform_3(%arg0: i32) -> (i32, i32) {
    %c0_i32 = arith.constant 0 : i32
    %c0_i32_0 = arith.constant 0 : i32
    return %arg0, %c0_i32 : i32, i32
  }
}

</mosaic_0001>

<bundles_post_ra>
// kernel: tpu_custom_call.1
= control target key start
LH: loop header
LB: loop body
LE: loop exit
PB: predicated region body
PF: predicated region fallthrough
CT: control target
= control target key end

     0   :  { %8 = vsyncpa [#allocation3], 0  ;;  %s469_s0 = inlined_call_operand.hbm [shape: f32[8,120], index: 0, kind: input, shape index: {}]   ;;  %s470_s1 = inlined_call_operand.hbm [shape: f32[120,768], index: 1, kind: input, shape index: {}]   ;;  %s471_s2 = inlined_call_operand.hbm [shape: f32[1,768], index: 2, kind: input, shape index: {}]   ;;  %s472_s3 = inlined_call_operand.hbm [shape: f32[8,768], index: 3, kind: output, shape index: {}]  }
   0x1   :  { %9 = vsyncpa [#allocation6], 0  ;;  %s26_s14 = sshll.u32 %s470_s1, 4  ;;  %s27_s14 = int_to_ptr.hbm [resolvable:$true] %s26_s14 }
   0x2   :  { %10 = vsyncpa [#allocation4], 0  ;;  %s425_s15 = smov [#allocation5]   ;;  %s16_s19 = sshll.u32 %s469_s0, 4  ;;  %s17_s19 = int_to_ptr.hbm [resolvable:$true] %s16_s19 }
   0x3   :  { %s28_s16 = sshll.u32 %s425_s15, 4  ;;  %s426_s20 = smov 768   ;;  %s29_s16 = int_to_ptr.vmem [resolvable:$true] %s28_s16 }
   0x4   :  { %s427_s21 = smov 48   ;;  %s428_s22 = smov [#allocation2]  }
   0x5   :  { %34 = dma.hbm_to_vmem [thread:$0]  %s27_s14, 11520, %s29_s16, [#allocation6], %s426_s20, %s426_s20, %s427_s21  }
   0x6   :  { %s18_s23 = sshll.u32 %s428_s22, 4  ;;  %s40_s26 = sshll.u32 %s471_s2, 4  ;;  %s19_s23 = int_to_ptr.vmem [resolvable:$true] %s18_s23  ;;  %s41_s26 = int_to_ptr.hbm [resolvable:$true] %s40_s26 }
   0x7   :  { %21 = dma.hbm_to_vmem [thread:$0]  %s17_s19, 128, %s19_s23, [#allocation3]  }
   0x8   :  { %s429_s1 = smov [#allocation7]  }
   0x9   :  { %s42_s27 = sshll.u32 %s429_s1, 4  ;;  %s43_s27 = int_to_ptr.vmem [resolvable:$true] %s42_s27 }
   0xa   :  { %45 = dma.hbm_to_vmem [thread:$0]  %s41_s26, 96, %s43_s27, [#allocation6]  }
   0xb   :  { %419 = dma.done.wait [#allocation3], 128  }
   0xc   :  { %420 = vsyncadd [#allocation3], 4294967168 }
   0xd   :  { %421 = dma.done.wait [#allocation6], 11616  }
   0xe   :  { %422 = vsyncadd [#allocation6], 4294955680  ;;  %v143_v0 = vld [vmem:[#allocation5 + $0x2a0] sm:$0xff]  ;;  %v144_v1 = vld [vmem:[#allocation5 + $0x2a8] sm:$0xff]  ;;  %vm163_vm0 = vcmask 982016   ;;  %s430_s0 = smov [#allocation8]  }
   0xf   :  { %v137_v2 = vld [vmem:[#allocation5 + $0x270] sm:$0xff]  ;;  %168 = vmatpush.msra.mxu0 %v143_v0  ;;  %188 = vmatpush.msra.mxu1 %v144_v1  ;;  %v138_v3 = vld [vmem:[#allocation5 + $0x278] sm:$0xff]  ;;  %v131_v4 = vld [vmem:[#allocation5 + $0x240] sm:$0xff]  ;;  %s298_s2 = sshll.u32 %s430_s0, 4  ;;  %s300_s30 = sshll.u32 %s472_s3, 4  ;;  %s299_s2 = int_to_ptr.vmem [resolvable:$true] %s298_s2  ;;  %s301_s30 = int_to_ptr.hbm [resolvable:$true] %s300_s30 }
  0x10   :  { %v132_v5 = vld [vmem:[#allocation5 + $0x248] sm:$0xff]  ;;  %v125_v6 = vld [vmem:[#allocation5 + $0x210] sm:$0xff]  ;;  %v126_v7 = vld [vmem:[#allocation5 + $0x218] sm:$0xff] }
  0x11   :  { %169 = vmatpush.msra.mxu0 %v137_v2  ;;  %189 = vmatpush.msra.mxu1 %v138_v3  ;;  %v119_v8 = vld [vmem:[#allocation5 + $0x1e0] sm:$0xff]  ;;  %v120_v9 = vld [vmem:[#allocation5 + $0x1e8] sm:$0xff]  ;;  %v113_v10 = vld [vmem:[#allocation5 + $0x1b0] sm:$0xff] }
  0x12   :  { %v114_v11 = vld [vmem:[#allocation5 + $0x1b8] sm:$0xff]  ;;  %v145_v12 = vld [vmem:[#allocation5 + $0x2b0] sm:$0xff]  ;;  %v139_v14 = vld [vmem:[#allocation5 + $0x280] sm:$0xff] }
  0x13   :  { %170 = vmatpush.msra.mxu0 %v131_v4  ;;  %190 = vmatpush.msra.mxu1 %v132_v5  ;;  %v146_v13 = vld [vmem:[#allocation5 + $0x2b8] sm:$0xff]  ;;  %v140_v15 = vld [vmem:[#allocation5 + $0x288] sm:$0xff]  ;;  %v107_v16 = vld [vmem:[#allocation5 + $0x180] sm:$0xff] }
  0x14   :  { %v108_v17 = vld [vmem:[#allocation5 + $0x188] sm:$0xff]  ;;  %208 = vmatpush.msra.mxu2 %v145_v12  ;;  %228 = vmatpush.msra.mxu3 %v146_v13  ;;  %v133_v18 = vld [vmem:[#allocation5 + $0x250] sm:$0xff]  ;;  %v134_v19 = vld [vmem:[#allocation5 + $0x258] sm:$0xff] }
  0x15   :  { %171 = vmatpush.msra.mxu0 %v125_v6  ;;  %191 = vmatpush.msra.mxu1 %v126_v7  ;;  %v101_v20 = vld [vmem:[#allocation5 + $0x150] sm:$0xff]  ;;  %v102_v21 = vld [vmem:[#allocation5 + $0x158] sm:$0xff]  ;;  %v127_v22 = vld [vmem:[#allocation5 + $0x220] sm:$0xff] }
  0x16   :  { %209 = vmatpush.msra.mxu2 %v139_v14  ;;  %229 = vmatpush.msra.mxu3 %v140_v15  ;;  %v128_v23 = vld [vmem:[#allocation5 + $0x228] sm:$0xff]  ;;  %v95_v24 = vld [vmem:[#allocation5 + $0x120] sm:$0xff]  ;;  %v121_v26 = vld [vmem:[#allocation5 + $0x1f0] sm:$0xff] }
  0x17   :  { %172 = vmatpush.msra.mxu0 %v119_v8  ;;  %192 = vmatpush.msra.mxu1 %v120_v9  ;;  %v96_v25 = vld [vmem:[#allocation5 + $0x128] sm:$0xff]  ;;  %v122_v27 = vld [vmem:[#allocation5 + $0x1f8] sm:$0xff]  ;;  %v89_v28 = vld [vmem:[#allocation5 + $0xf0] sm:$0xff] }
  0x18   :  { %210 = vmatpush.msra.mxu2 %v133_v18  ;;  %230 = vmatpush.msra.mxu3 %v134_v19  ;;  %v90_v29 = vld [vmem:[#allocation5 + $0xf8] sm:$0xff]  ;;  %v115_v30 = vld [vmem:[#allocation5 + $0x1c0] sm:$0xff]  ;;  %v116_v31 = vld [vmem:[#allocation5 + $0x1c8] sm:$0xff] }
  0x19   :  { %173 = vmatpush.msra.mxu0 %v113_v10  ;;  %193 = vmatpush.msra.mxu1 %v114_v11  ;;  %v83_v32 = vld [vmem:[#allocation5 + $0xc0] sm:$0xff]  ;;  %v84_v33 = vld [vmem:[#allocation5 + $0xc8] sm:$0xff]  ;;  %v109_v34 = vld [vmem:[#allocation5 + $0x190] sm:$0xff] }
  0x1a   :  { %211 = vmatpush.msra.mxu2 %v127_v22  ;;  %231 = vmatpush.msra.mxu3 %v128_v23  ;;  %v110_v35 = vld [vmem:[#allocation5 + $0x198] sm:$0xff]  ;;  %v77_v36 = vld [vmem:[#allocation5 + $0x90] sm:$0xff]  ;;  %v103_v38 = vld [vmem:[#allocation5 + $0x160] sm:$0xff] }
  0x1b   :  { %174 = vmatpush.msra.mxu0 %v107_v16  ;;  %194 = vmatpush.msra.mxu1 %v108_v17  ;;  %v78_v37 = vld [vmem:[#allocation5 + $0x98] sm:$0xff]  ;;  %v104_v39 = vld [vmem:[#allocation5 + $0x168] sm:$0xff]  ;;  %v71_v40 = vld [vmem:[#allocation5 + $0x60] sm:$0xff] }
  0x1c   :  { %212 = vmatpush.msra.mxu2 %v121_v26  ;;  %232 = vmatpush.msra.mxu3 %v122_v27  ;;  %v72_v41 = vld [vmem:[#allocation5 + $0x68] sm:$0xff]  ;;  %v97_v42 = vld [vmem:[#allocation5 + $0x130] sm:$0xff]  ;;  %v98_v43 = vld [vmem:[#allocation5 + $0x138] sm:$0xff] }
  0x1d   :  { %175 = vmatpush.msra.mxu0 %v101_v20  ;;  %195 = vmatpush.msra.mxu1 %v102_v21  ;;  %v65_v44 = vld [vmem:[#allocation5 + $0x30] sm:$0xff]  ;;  %v66_v45 = vld [vmem:[#allocation5 + $0x38] sm:$0xff]  ;;  %v91_v46 = vld [vmem:[#allocation5 + $0x100] sm:$0xff] }
  0x1e   :  { %213 = vmatpush.msra.mxu2 %v115_v30  ;;  %233 = vmatpush.msra.mxu3 %v116_v31  ;;  %v92_v47 = vld [vmem:[#allocation5 + $0x108] sm:$0xff]  ;;  %v59_v48 = vld [vmem:[#allocation5] sm:$0xff]  ;;  %v85_v52 = vld [vmem:[#allocation5 + $0xd0] sm:$0xff] }
  0x1f   :  { %176 = vmatpush.msra.mxu0 %v95_v24  ;;  %196 = vmatpush.msra.mxu1 %v96_v25  ;;  %v60_v49 = vld [vmem:[#allocation5 + $0x8] sm:$0xff]  ;;  %v147_v50 = vld [vmem:[#allocation5 + $0x2c0] sm:$0xff]  ;;  %v86_v53 = vld [vmem:[#allocation5 + $0xd8] sm:$0xff] }
  0x20   :  { %214 = vmatpush.msra.mxu2 %v109_v34  ;;  %234 = vmatpush.msra.mxu3 %v110_v35  ;;  %v148_v51 = vld [vmem:[#allocation5 + $0x2c8] sm:$0xff]  ;;  %v141_v54 = vld [vmem:[#allocation5 + $0x290] sm:$0xff]  ;;  %v142_v55 = vld [vmem:[#allocation5 + $0x298] sm:$0xff] }
  0x21   :  { %177 = vmatpush.msra.mxu0 %v89_v28  ;;  %197 = vmatpush.msra.mxu1 %v90_v29  ;;  %v79_v56 = vld [vmem:[#allocation5 + $0xa0] sm:$0xff]  ;;  %v80_v57 = vld [vmem:[#allocation5 + $0xa8] sm:$0xff]  ;;  %v73_v60 = vld [vmem:[#allocation5 + $0x70] sm:$0xff] }
  0x22   :  { %215 = vmatpush.msra.mxu2 %v103_v38  ;;  %235 = vmatpush.msra.mxu3 %v104_v39  ;;  %v135_v58 = vld [vmem:[#allocation5 + $0x260] sm:$0xff]  ;;  %v136_v59 = vld [vmem:[#allocation5 + $0x268] sm:$0xff]  ;;  %v74_v61 = vld [vmem:[#allocation5 + $0x78] sm:$0xff] }
  0x23   :  { %178 = vmatpush.msra.mxu0 %v83_v32  ;;  %198 = vmatpush.msra.mxu1 %v84_v33  ;;  %v129_v62 = vld [vmem:[#allocation5 + $0x230] sm:$0xff]  ;;  %v130_v63 = vld [vmem:[#allocation5 + $0x238] sm:$0xff]  ;;  %v67_v0 = vld [vmem:[#allocation5 + $0x40] sm:$0xff] }
  0x24   :  { %216 = vmatpush.msra.mxu2 %v97_v42  ;;  %236 = vmatpush.msra.mxu3 %v98_v43  ;;  %v68_v1 = vld [vmem:[#allocation5 + $0x48] sm:$0xff]  ;;  %v123_v2 = vld [vmem:[#allocation5 + $0x200] sm:$0xff]  ;;  %v58_v4 = vld [vmem:[#allocation2] sm:$0xff] }
  0x25   :  { %179 = vmatpush.msra.mxu0 %v77_v36  ;;  %199 = vmatpush.msra.mxu1 %v78_v37  ;;  %v124_v3 = vld [vmem:[#allocation5 + $0x208] sm:$0xff]  ;;  %v117_v5 = vld [vmem:[#allocation5 + $0x1d0] sm:$0xff]  ;;  %v118_v6 = vld [vmem:[#allocation5 + $0x1d8] sm:$0xff] }
  0x26   :  { %217 = vmatpush.msra.mxu2 %v91_v46  ;;  %237 = vmatpush.msra.mxu3 %v92_v47  ;;  %v61_v7 = vld [vmem:[#allocation5 + $0x10] sm:$0xff]  ;;  %v62_v8 = vld [vmem:[#allocation5 + $0x18] sm:$0xff]  ;;  %v111_v9 = vld [vmem:[#allocation5 + $0x1a0] sm:$0xff] }
  0x27   :  { %180 = vmatpush.msra.mxu0 %v71_v40  ;;  %200 = vmatpush.msra.mxu1 %v72_v41  ;;  %v112_v10 = vld [vmem:[#allocation5 + $0x1a8] sm:$0xff]  ;;  %v105_v11 = vld [vmem:[#allocation5 + $0x170] sm:$0xff]  ;;  %v106_v12 = vld [vmem:[#allocation5 + $0x178] sm:$0xff] }
  0x28   :  { %218 = vmatpush.msra.mxu2 %v85_v52  ;;  %238 = vmatpush.msra.mxu3 %v86_v53  ;;  %v99_v13 = vld [vmem:[#allocation5 + $0x140] sm:$0xff]  ;;  %v100_v14 = vld [vmem:[#allocation5 + $0x148] sm:$0xff]  ;;  %v93_v15 = vld [vmem:[#allocation5 + $0x110] sm:$0xff] }
  0x29   :  { %181 = vmatpush.msra.mxu0 %v65_v44  ;;  %201 = vmatpush.msra.mxu1 %v66_v45  ;;  %v94_v16 = vld [vmem:[#allocation5 + $0x118] sm:$0xff]  ;;  %v87_v17 = vld [vmem:[#allocation5 + $0xe0] sm:$0xff]  ;;  %v88_v18 = vld [vmem:[#allocation5 + $0xe8] sm:$0xff] }
  0x2a   :  { %219 = vmatpush.msra.mxu2 %v79_v56  ;;  %239 = vmatpush.msra.mxu3 %v80_v57  ;;  %v81_v19 = vld [vmem:[#allocation5 + $0xb0] sm:$0xff]  ;;  %v82_v20 = vld [vmem:[#allocation5 + $0xb8] sm:$0xff]  ;;  %v75_v21 = vld [vmem:[#allocation5 + $0x80] sm:$0xff] }
  0x2b   :  { %182 = vmatpush.msra.mxu0 %v59_v48  ;;  %202 = vmatpush.msra.mxu1 %v60_v49  ;;  %v76_v22 = vld [vmem:[#allocation5 + $0x88] sm:$0xff]  ;;  %v69_v23 = vld [vmem:[#allocation5 + $0x50] sm:$0xff]  ;;  %v70_v24 = vld [vmem:[#allocation5 + $0x58] sm:$0xff] }
  0x2c   :  { %220 = vmatpush.msra.mxu2 %v73_v60  ;;  %240 = vmatpush.msra.mxu3 %v74_v61  ;;  %v63_v25 = vld [vmem:[#allocation5 + $0x20] sm:$0xff]  ;;  %v64_v26 = vld [vmem:[#allocation5 + $0x28] sm:$0xff]  ;;  %v149_v27 = vld [vmem:[#allocation7] sm:$0x3f] }
  0x2d   :  { %248 = vmatpush.msrb.mxu0 %v147_v50  ;;  %268 = vmatpush.msrb.mxu1 %v148_v51  ;;  %v151_v28 = vperm.slane %v149_v27, 0  ;;  %v152_v29 = vperm.slane %v149_v27, 1  ;;  %v153_v34 = vperm.slane %v149_v27, 2  ;;  %v154_v35 = vperm.slane %v149_v27, 3 }
  0x2e   :  { %221 = vmatpush.msra.mxu2 %v67_v0  ;;  %241 = vmatpush.msra.mxu3 %v68_v1  ;;  %v155_v40 = vperm.slane %v149_v27, 4  ;;  %v156_v41 = vperm.slane %v149_v27, 5 }
  0x2f   :  { %249 = vmatpush.msrb.mxu0 %v141_v54  ;;  %269 = vmatpush.msrb.mxu1 %v142_v55 }
  0x30   :  { %311 = vmatmul.msk.f32.vlgmr.msra.gmra.mxu0 %vm163_vm0, %v58_v4  ;;  %312 = vmatmul.msk.f32.vlgmr.msra.gmra.mxu1 %vm163_vm0, %v58_v4 }
  0x31   :  { %250 = vmatpush.msrb.mxu0 %v135_v58  ;;  %270 = vmatpush.msrb.mxu1 %v136_v59 }
  0x32   :  { %222 = vmatpush.msra.mxu2 %v61_v7  ;;  %242 = vmatpush.msra.mxu3 %v62_v8 }
  0x33   :  { %251 = vmatpush.msrb.mxu0 %v129_v62  ;;  %271 = vmatpush.msrb.mxu1 %v130_v63 }
  0x34   :  { %313 = vmatmul.msk.f32.vlgmr.msra.gmra.mxu2 %vm163_vm0, %v58_v4  ;;  %314 = vmatmul.msk.f32.vlgmr.msra.gmra.mxu3 %vm163_vm0, %v58_v4 }
  0x35   :  { %252 = vmatpush.msrb.mxu0 %v123_v2  ;;  %272 = vmatpush.msrb.mxu1 %v124_v3 }
  0x37   :  { %253 = vmatpush.msrb.mxu0 %v117_v5  ;;  %273 = vmatpush.msrb.mxu1 %v118_v6 }
  0x39   :  { %254 = vmatpush.msrb.mxu0 %v111_v9  ;;  %274 = vmatpush.msrb.mxu1 %v112_v10 }
  0x3b   :  { %255 = vmatpush.msrb.mxu0 %v105_v11  ;;  %275 = vmatpush.msrb.mxu1 %v106_v12 }
  0x3d   :  { %256 = vmatpush.msrb.mxu0 %v99_v13  ;;  %276 = vmatpush.msrb.mxu1 %v100_v14 }
  0x3f   :  { %257 = vmatpush.msrb.mxu0 %v93_v15  ;;  %277 = vmatpush.msrb.mxu1 %v94_v16 }
  0x41   :  { %258 = vmatpush.msrb.mxu0 %v87_v17  ;;  %278 = vmatpush.msrb.mxu1 %v88_v18 }
  0x43   :  { %259 = vmatpush.msrb.mxu0 %v81_v19  ;;  %279 = vmatpush.msrb.mxu1 %v82_v20 }
  0x45   :  { %260 = vmatpush.msrb.mxu0 %v75_v21  ;;  %280 = vmatpush.msrb.mxu1 %v76_v22 }
  0x47   :  { %261 = vmatpush.msrb.mxu0 %v69_v23  ;;  %281 = vmatpush.msrb.mxu1 %v70_v24 }
  0x49   :  { %262 = vmatpush.msrb.mxu0 %v63_v25  ;;  %282 = vmatpush.msrb.mxu1 %v64_v26 }
  0x4a   :  { %315 = vmatmul.msk.f32.vlgmr.msrb.gmra.mxu0 %vm163_vm0, %v58_v4  ;;  %316 = vmatmul.msk.f32.vlgmr.msrb.gmra.mxu1 %vm163_vm0, %v58_v4 }
  0xad   :  { %v184_v30 = vpop.f32.mrf.mxu0  ;;  %v204_v31 = vpop.f32.mrf.mxu1 }
  0xae   :  { %v185_v32 = vadd.f32 %v184_v30, %v151_v28  ;;  %v205_v33 = vadd.f32 %v204_v31, %v152_v29 }
  0xb0   :  { %287 = vst [vmem:[#allocation8] sm:$0xff] %v185_v32 }
  0xb1   :  { %288 = vst [vmem:[#allocation8 + $0x8] sm:$0xff] %v205_v33 }
  0xb7   :  { %v224_v36 = vpop.f32.mrf.mxu2  ;;  %v244_v37 = vpop.f32.mrf.mxu3 }
  0xb8   :  { %v225_v38 = vadd.f32 %v224_v36, %v153_v34  ;;  %v245_v39 = vadd.f32 %v244_v37, %v154_v35 }
  0xba   :  { %289 = vst [vmem:[#allocation8 + $0x10] sm:$0xff] %v225_v38 }
  0xbb   :  { %290 = vst [vmem:[#allocation8 + $0x18] sm:$0xff] %v245_v39 }
  0xc7   :  { %v264_v42 = vpop.f32.mrf.mxu0  ;;  %v284_v43 = vpop.f32.mrf.mxu1 }
  0xc8   :  { %v265_v44 = vadd.f32 %v264_v42, %v155_v40  ;;  %v285_v45 = vadd.f32 %v284_v43, %v156_v41 }
  0xca   :  { %291 = vst [vmem:[#allocation8 + $0x20] sm:$0xff] %v265_v44 }
  0xcb   :  { %292 = vst [vmem:[#allocation8 + $0x28] sm:$0xff] %v285_v45 }
  0xcc   :  { %303 = dma.vmem_to_hbm [thread:$0]  %s299_s2, 768, %s301_s30, [#allocation4]  }
  0xcd   :  { %423 = dma.done.wait [#allocation4], 768  }
  0xce   :  { %424 = vsyncadd [#allocation4], 4294966528 }
  0xcf   :  { %308 = vsyncpa [#allocation3], 1 }
  0xd0   :  { %309 = vsyncpa [#allocation6], 1 }
  0xd1   :  { %310 = vsyncpa [#allocation4], 1 }

</bundles_post_ra>
